<compile_context>
chip_gen: v7x
topology: tpu7x:2x2x1
jax: 0.10.0
libtpu: 0.0.40
codegen_flags: <defaults>
</compile_context>

<pallas_src>
import jax
import jax.numpy as jnp
from jax.experimental import pallas as pl
from jax.experimental.pallas import tpu as pltpu  # noqa: F401  (TPU backend; no extra params needed at this size)

# ---- sizes implied by the module (Linear(128,1) after MaxPool1d(8) over Conv1d k=3 => L=130) ----
B = 2                      # batch
L = 130                    # sequence length (tokens)
E = 32                     # embedding_dim (small synthetic choice)
C_OUT = 8                  # conv out channels
K = 3                      # conv kernel size
L_CONV = L - K + 1         # 128
POOL = 8
T_POOL = L_CONV // POOL    # 16
FC_IN = C_OUT * T_POOL     # 128  (matches nn.Linear(128, 1))
VOCAB = 256                # synthetic vocab (module uses 12849; lookup semantics identical)


def cnn_text_kernel(xcols_ref, wconv_ref, bconv_ref, wfc_ref, bfc_ref, out_ref):
    """Fused conv1d(+bias+ReLU) + maxpool + fc + sigmoid for the WHOLE batch in one invocation.

    xcols_ref: (K*E, B*L_CONV)  im2col'd embeddings, column index = b*L_CONV + t
    wconv_ref: (C_OUT, K*E)     conv weights, wconv[o, k*E + c] == torch W[o, c, k]
    bconv_ref: (C_OUT, 1)       conv bias (broadcast along lanes)
    wfc_ref  : (1, FC_IN)       fc weights (torch layout, channel-major flatten order)
    bfc_ref  : (1, 1)           fc bias
    out_ref  : (B, 1)           output probabilities
    """
    # --- Conv1d for all batch rows as ONE MXU matmul -> (C_OUT=8, B*L_CONV=256), lane-dense.
    conv = jnp.dot(wconv_ref[...], xcols_ref[...],
                   preferred_element_type=jnp.float32)            # (8, 256)
    conv = jnp.maximum(conv + bconv_ref[...], 0.0)                # bias + ReLU (full-lane VPU)

    # --- MaxPool1d(8) + channel-major flatten (matches torch .view(B, -1)); B=2 statically unrolled.
    rows = []
    for b in range(B):                                            # static Python unroll
        cb = conv[:, b * L_CONV:(b + 1) * L_CONV]                 # (8, 128) static lane slice
        pb = jnp.max(cb.reshape(C_OUT, T_POOL, POOL), axis=-1)    # (8, 16)
        rows.append(pb.reshape(1, FC_IN))                         # (1, 128), index = c*T_POOL + t
    flat = jnp.concatenate(rows, axis=0)                          # (B, 128) lane-dense

    # --- Linear(128, 1): VPU multiply + lane reduction, then bias + sigmoid, one (B,1) store.
    logits = jnp.sum(flat * wfc_ref[...], axis=1, keepdims=True) + bfc_ref[...]   # (B, 1)
    out_ref[...] = jax.nn.sigmoid(logits)


def cnn_text_classifier(tokens, emb_table, w_conv, b_conv, w_fc, b_fc):
    """tokens: (B, L) int32.  Parameters use PyTorch shapes:
    emb_table (VOCAB, E), w_conv (C_OUT, E, K), b_conv (C_OUT,), w_fc (1, FC_IN), b_fc (1,)."""
    # Embedding lookup (data-dependent gather) is glue, done in plain JAX.
    # TODO(synk): at real vocab/batch sizes, fuse the gather via scalar-prefetched token ids +
    # per-row DMA (or emit bf16 here) to avoid the extra HBM round-trip.
    emb = jnp.take(emb_table, tokens, axis=0).astype(jnp.float32)             # (B, L, E)

    # im2col, transposed for the (8, K*E) @ (K*E, B*L_CONV) kernel matmul:
    #   x_cols[k*E + c, b*L_CONV + t] = emb[b, t + k, c]
    taps = jnp.stack([emb[:, k:k + L_CONV, :] for k in range(K)], axis=0)     # (K, B, L_CONV, E)
    x_cols = jnp.transpose(taps, (0, 3, 1, 2)).reshape(K * E, B * L_CONV)     # (96, 256)

    # Conv weight (C_OUT, E, K) -> (C_OUT, K*E), k-major to match the im2col column order.
    w_flat = jnp.transpose(w_conv, (0, 2, 1)).reshape(C_OUT, K * E)           # (8, 96)
    b_conv_col = b_conv.reshape(C_OUT, 1)                                     # (8, 1)

    # fc weight used as-is: kernel flattens pooled features channel-major, same as torch .view.
    w_fc_row = w_fc.reshape(1, FC_IN)                                         # (1, 128)
    b_fc_2d = b_fc.reshape(1, 1)                                              # (1, 1)

    # Single invocation, no grid: whole-array blocks, one pipeline step total.
    return pl.pallas_call(
        cnn_text_kernel,
        out_shape=jax.ShapeDtypeStruct((B, 1), jnp.float32),
    )(x_cols, w_flat, b_conv_col, w_fc_row, b_fc_2d)


def reference(tokens, emb_table, w_conv, b_conv, w_fc, b_fc):
    """Plain-JAX replica of the PyTorch forward, for a correctness check."""
    emb = emb_table[tokens]                                         # (B, L, E)
    x = jnp.transpose(emb, (0, 2, 1))                               # (B, E, L)
    out = jnp.zeros((B, C_OUT, L_CONV), jnp.float32)
    for k in range(K):
        out = out + jnp.einsum('bel,oe->bol', x[:, :, k:k + L_CONV], w_conv[:, :, k])
    out = jax.nn.relu(out + b_conv[None, :, None])
    pooled = jnp.max(out.reshape(B, C_OUT, T_POOL, POOL), axis=-1)  # (B, C_OUT, T_POOL)
    flat = pooled.reshape(B, FC_IN)                                 # channel-major, like .view
    logit = flat @ w_fc.T + b_fc
    return jax.nn.sigmoid(logit)


if __name__ == "__main__":
    key = jax.random.PRNGKey(0)
    k_tok, k_emb, k_wc, k_bc, k_wf, k_bf = jax.random.split(key, 6)

    tokens = jax.random.randint(k_tok, (B, L), 0, VOCAB, dtype=jnp.int32)
    emb_table = 0.1 * jax.random.normal(k_emb, (VOCAB, E), dtype=jnp.float32)
    w_conv = 0.1 * jax.random.normal(k_wc, (C_OUT, E, K), dtype=jnp.float32)
    b_conv = 0.1 * jax.random.normal(k_bc, (C_OUT,), dtype=jnp.float32)
    w_fc = 0.1 * jax.random.normal(k_wf, (1, FC_IN), dtype=jnp.float32)
    b_fc = 0.1 * jax.random.normal(k_bf, (1,), dtype=jnp.float32)

    out = cnn_text_classifier(tokens, emb_table, w_conv, b_conv, w_fc, b_fc)
    out = jax.block_until_ready(out)

    ref = reference(tokens, emb_table, w_conv, b_conv, w_fc, b_fc)
    assert out.shape == (B, 1), out.shape
    assert jnp.allclose(out, ref, atol=1e-5, rtol=1e-5), (out, ref)
    print("KERNEL_OK")
</pallas_src>

<mosaic_0001>
module attributes {stable_mosaic.version = 11 : i64} {
  func.func @cnn_text_kernel(%arg0: memref<96x256xf32, #tpu.memory_space<vmem>>, %arg1: memref<8x96xf32, #tpu.memory_space<vmem>>, %arg2: memref<8x1xf32, #tpu.memory_space<vmem>>, %arg3: memref<1x128xf32, #tpu.memory_space<vmem>>, %arg4: memref<1x1xf32, #tpu.memory_space<vmem>>, %arg5: memref<2x1xf32, #tpu.memory_space<vmem>>) attributes {dimension_semantics = [], scalar_prefetch = 0 : i64, scratch_operands = 0 : i64, tpu.core_type = #tpu.core_type<tc>} {
    %c0 = arith.constant 0 : index
    %c0_0 = arith.constant 0 : index
    %0 = vector.load %arg1[%c0, %c0_0] : memref<8x96xf32, #tpu.memory_space<vmem>>, vector<8x96xf32>
    %c0_1 = arith.constant 0 : index
    %c0_2 = arith.constant 0 : index
    %1 = vector.load %arg0[%c0_1, %c0_2] : memref<96x256xf32, #tpu.memory_space<vmem>>, vector<96x256xf32>
    %cst = arith.constant dense<0.000000e+00> : vector<8x256xf32>
    %2 = tpu.matmul %0, %1, %cst {dimension_numbers = #tpu.dot_dimension_numbers<[1], [0], [0], [1], [0, 0, 1, 1], [], []>} : vector<8x96xf32>, vector<96x256xf32>, vector<8x256xf32> -> vector<8x256xf32>
    %c0_3 = arith.constant 0 : index
    %c0_4 = arith.constant 0 : index
    %3 = vector.load %arg2[%c0_3, %c0_4] : memref<8x1xf32, #tpu.memory_space<vmem>>, vector<8x1xf32>
    %4 = vector.broadcast %3 : vector<8x1xf32> to vector<8x256xf32>
    %5 = arith.addf %2, %4 : vector<8x256xf32>
    %cst_5 = arith.constant 0.000000e+00 : f32
    %6 = vector.broadcast %cst_5 : f32 to vector<8x256xf32>
    %7 = arith.maximumf %5, %6 : vector<8x256xf32>
    %8 = vector.extract_strided_slice %7 {offsets = [0, 0], sizes = [8, 128], strides = [1, 1]} : vector<8x256xf32> to vector<8x128xf32>
    %9 = vector.shape_cast %8 : vector<8x128xf32> to vector<8x16x8xf32>
    %cst_6 = arith.constant dense<0xFF800000> : vector<8x16xf32>
    %10 = vector.multi_reduction <maximumf>, %9, %cst_6 [2] : vector<8x16x8xf32> to vector<8x16xf32>
    %11 = vector.shape_cast %10 : vector<8x16xf32> to vector<1x128xf32>
    %12 = vector.extract_strided_slice %7 {offsets = [0, 128], sizes = [8, 128], strides = [1, 1]} : vector<8x256xf32> to vector<8x128xf32>
    %13 = vector.shape_cast %12 : vector<8x128xf32> to vector<8x16x8xf32>
    %cst_7 = arith.constant dense<0xFF800000> : vector<8x16xf32>
    %14 = vector.multi_reduction <maximumf>, %13, %cst_7 [2] : vector<8x16x8xf32> to vector<8x16xf32>
    %15 = vector.shape_cast %14 : vector<8x16xf32> to vector<1x128xf32>
    %16 = tpu.concatenate %11, %15 in 0 : vector<1x128xf32>, vector<1x128xf32> -> vector<2x128xf32>
    %c0_8 = arith.constant 0 : index
    %c0_9 = arith.constant 0 : index
    %17 = vector.load %arg3[%c0_8, %c0_9] : memref<1x128xf32, #tpu.memory_space<vmem>>, vector<1x128xf32>
    %18 = vector.broadcast %17 : vector<1x128xf32> to vector<2x128xf32>
    %19 = arith.mulf %16, %18 : vector<2x128xf32>
    %cst_10 = arith.constant dense<0.000000e+00> : vector<2xf32>
    %20 = vector.multi_reduction <add>, %19, %cst_10 [1] : vector<2x128xf32> to vector<2xf32>
    %21 = vector.shape_cast %20 : vector<2xf32> to vector<2x1xf32>
    %c0_11 = arith.constant 0 : index
    %c0_12 = arith.constant 0 : index
    %22 = vector.load %arg4[%c0_11, %c0_12] : memref<1x1xf32, #tpu.memory_space<vmem>>, vector<1x1xf32>
    %23 = vector.broadcast %22 : vector<1x1xf32> to vector<2x1xf32>
    %24 = arith.addf %21, %23 : vector<2x1xf32>
    %25 = arith.negf %24 : vector<2x1xf32>
    %26 = math.exp %25 : vector<2x1xf32>
    %cst_13 = arith.constant 1.000000e+00 : f32
    %27 = vector.broadcast %cst_13 : f32 to vector<2x1xf32>
    %28 = arith.addf %27, %26 : vector<2x1xf32>
    %29 = arith.divf %27, %28 : vector<2x1xf32>
    %c0_14 = arith.constant 0 : index
    %c0_15 = arith.constant 0 : index
    %30 = vector.load %arg5[%c0_14, %c0_15] : memref<2x1xf32, #tpu.memory_space<vmem>>, vector<2x1xf32>
    tpu.vector_store %arg5[%c0_14, %c0_15], %29 {strides = array<i32>} : memref<2x1xf32, #tpu.memory_space<vmem>>, vector<2x1xf32>,
    return
  }
}

</mosaic_0001>

<bundles_post_ra>
// kernel: tpu_custom_call.1
= control target key start
LH: loop header
LB: loop body
LE: loop exit
PB: predicated region body
PF: predicated region fallthrough
CT: control target
= control target key end

     0   :  { %s1711_s0 = inlined_call_operand.hbm [shape: f32[96,256], index: 0, kind: input, shape index: {}]   ;;  %s1712_s1 = inlined_call_operand.vmem [shape: f32[8,96], index: 1, kind: input, shape index: {}]   ;;  %s1713_s2 = inlined_call_operand.vmem [shape: f32[8,1], index: 2, kind: input, shape index: {}]   ;;  %s1714_s3 = inlined_call_operand.vmem [shape: f32[1,128], index: 3, kind: input, shape index: {}]   ;;  %s1715_s4 = inlined_call_operand.<no memory space> [shape: f32[1,1], index: 4, kind: input, shape index: {}]   ;;  %s1716_s5 = inlined_call_operand.vmem [shape: f32[2,1], index: 5, kind: output, shape index: {}]  }
   0x1   :  { %v10_v0 = vstv %s1715_s4 }
   0x2   :  { %11 = vst [vmem:[#allocation2] sm:$0x1] %v10_v0 }
   0x3   :  { %12 = vsyncpa [#allocation4], 0  ;;  %s1214_s20 = smov [#allocation3]   ;;  %s1190_s24 = scalar_lea.hbm %s1711_s0, 3072 }
   0x4   :  { %s18_s21 = sshll.u32 %s1214_s20, 4  ;;  %p1191_p0 = scmp.ne.s32.totalorder %s1711_s0, %s1190_s24  ;;  %s19_s21 = int_to_ptr.vmem [resolvable:$true] %s18_s21 }
   0x5   :  { %p1194_p1 = scmp.lt.u32.totalorder %s1190_s24, %s1711_s0 }
   0x7   :  { %p1196_p2 = pnand %p1194_p1, %p1191_p0 }
   0x9   :  { %1199 = shalt.err (!%p1196_p2)
}
   0xa   :  { %s1200_s4 = scalar_lea.vmem %s19_s21, 3072  ;;  %p1205_p4 = scmp.lt.s32.totalorder %s19_s21, %s19_s21 }
   0xb   :  { %p1201_p3 = scmp.ne.s32.totalorder %s19_s21, %s1200_s4  ;;  %p1206_p5 = scmp.lt.s32.totalorder %s1200_s4, %s1200_s4 }
   0xd   :  { %p1207_p6 = por %p1206_p5, %p1205_p4 }
   0xf   :  { %p1208_p7 = pnand %p1207_p6, %p1201_p3 }
  0x11   :  { %1211 = shalt.err (!%p1208_p7)
}
  0x12   :  { %s1215_s29 = smov 256   ;;  %s1216_s30 = smov 16  }
  0x13   :  { %24 = dma.hbm_to_vmem [thread:$0]  %s1711_s0, 3072, %s19_s21, [#allocation4], %s1215_s29, %s1215_s29, %s1216_s30  }
  0x14   :  { %1212 = dma.done.wait [#allocation4], 3072  }
  0x15   :  { %1213 = vsyncadd [#allocation4], 4294964224  ;;  %v1217_v1 = vmov 0.0   ;;  %v1218_v2 = vmov 0   ;;  %v38_v3 = vld [vmem:[#allocation3 + $0x8] sm:$0xff]  ;;  %v40_v4 = vld [vmem:[#allocation3 + $0x18] sm:$0xff]  ;;  %v195_v52 = vlaneseq }
  0x16   :  { %135 = vmatprep.mubr.f32.mxu0 %v1217_v1  ;;  %1185 = vset.pattern.permute.xlu0 %v1218_v2  ;;  %v37_v5 = vld [vmem:[#allocation3] sm:$0xff]  ;;  %v1140_v6 = vpack.c.bf16 %v40_v4, %v38_v3  ;;  %v39_v7 = vld [vmem:[#allocation3 + $0x10] sm:$0xff]  ;;  %v42_v8 = vld [vmem:[#allocation3 + $0x28] sm:$0xff]  ;;  %vm67_vm0 = vcmask 785408   ;;  %s1219_s10 = smov 112   ;;  %s1220_s11 = smov 120  }
  0x17   :  { %v44_v9 = vld [vmem:[#allocation3 + $0x38] sm:$0xff]  ;;  %v1142_v10 = vpack.c.bf16 %v39_v7, %v37_v5  ;;  %v41_v12 = vld [vmem:[#allocation3 + $0x20] sm:$0xff]  ;;  %v43_v13 = vld [vmem:[#allocation3 + $0x30] sm:$0xff]  ;;  %s1221_s12 = smov 104   ;;  %s1222_s13 = smov 96   ;;  %v1326_v56 = vshrl.u32 %v195_v52, 7 }
  0x18   :  { %v1144_v11 = vpack.c.bf16 %v44_v9, %v42_v8  ;;  %v46_v14 = vld [vmem:[#allocation3 + $0x48] sm:$0xff]  ;;  %1141 = vmatprep.subr.bf16.mxu0 %v1140_v6  ;;  %v48_v15 = vld [vmem:[#allocation3 + $0x58] sm:$0xff]  ;;  %v1146_v16 = vpack.c.bf16 %v43_v13, %v41_v12  ;;  %v45_v18 = vld [vmem:[#allocation3 + $0x40] sm:$0xff]  ;;  %s1224_s14 = smov 80   ;;  %s1225_s15 = smov 72   ;;  %vm462_vm1 = vcmask 64512  }
  0x19   :  { %1143 = vmatpush1.bf16.msra.mxu0 %v1142_v10  ;;  %v1148_v17 = vpack.c.bf16 %v48_v15, %v46_v14  ;;  %v47_v19 = vld [vmem:[#allocation3 + $0x50] sm:$0xff]  ;;  %v50_v20 = vld [vmem:[#allocation3 + $0x68] sm:$0xff]  ;;  %v52_v21 = vld [vmem:[#allocation3 + $0x78] sm:$0xff]  ;;  %s1226_s16 = smov 64   ;;  %s1227_s17 = smov 56   ;;  %vm904_vm2 = vcmask 130112  }
  0x1a   :  { %1145 = vmatprep.subr.bf16.mxu0 %v1144_v11  ;;  %v1150_v22 = vpack.c.bf16 %v47_v19, %v45_v18  ;;  %v61_v23 = vld [vmem:[%s1713_s2] sm:$0xff]  ;;  %v1152_v24 = vpack.c.bf16 %v52_v21, %v50_v20  ;;  %v51_v26 = vld [vmem:[#allocation3 + $0x70] sm:$0xff]  ;;  %v54_v27 = vld [vmem:[#allocation3 + $0x88] sm:$0xff]  ;;  %s1228_s18 = smov 48   ;;  %s1229_s19 = smov 40   ;;  %vm911_vm3 = vcmask 195712  }
  0x1b   :  { %v49_v25 = vld [vmem:[#allocation3 + $0x60] sm:$0xff]  ;;  %64 = vperm.xlu0 %1185, %v61_v23   ;;  %v56_v28 = vld [vmem:[#allocation3 + $0x98] sm:$0xff]  ;;  %v55_v32 = vld [vmem:[#allocation3 + $0x90] sm:$0xff]  ;;  %s1230_s20 = smov 32   ;;  %s1231_s21 = smov 24   ;;  %vm918_vm4 = vcmask 261312  }
  0x1c   :  { %v1154_v29 = vpack.c.bf16 %v51_v26, %v49_v25  ;;  %v1156_v30 = vpack.c.bf16 %v56_v28, %v54_v27  ;;  %v53_v31 = vld [vmem:[#allocation3 + $0x80] sm:$0xff]  ;;  %v58_v33 = vld [vmem:[#allocation3 + $0xa8] sm:$0xff]  ;;  %v60_v34 = vld [vmem:[#allocation3 + $0xb8] sm:$0xff]  ;;  %s1232_s22 = smov 8   ;;  %v1233_v50 = vmov 1983009808  }
  0x1d   :  { %1147 = vmatpush1.bf16.msra.mxu0 %v1146_v16  ;;  %v1158_v35 = vpack.c.bf16 %v55_v32, %v53_v31  ;;  %v1160_v36 = vpack.c.bf16 %v60_v34, %v58_v33  ;;  %v57_v37 = vld [vmem:[#allocation3 + $0xa0] sm:$0xff]  ;;  %v59_v38 = vld [vmem:[#allocation3 + $0xb0] sm:$0xff]  ;;  %v193_v51 = vunpack.c.l.s4 %v1233_v50  ;;  %v1234_v57 = vmov 1934713408  }
  0x1e   :  { %1149 = vmatprep.subr.bf16.mxu0 %v1148_v17  ;;  %v1162_v39 = vpack.c.bf16 %v59_v38, %v57_v37  ;;  %v36_v40 = vld [vmem:[%s1712_s1] sm:$0xff]  ;;  %s1223_s1 = smov 88   ;;  %v257_v58 = vunpack.c.l.s4 %v1234_v57  ;;  %vm925_vm5 = vcmask 326912   ;;  %vm932_vm6 = vcmask 392512  }
  0x1f   :  { %v194_v55 = vunpack.c.0.s8 %v193_v51  ;;  %vm939_vm7 = vcmask 458112   ;;  %vm946_vm8 = vcmask 523712   ;;  %vm953_vm9 = vcmask 589312  }
  0x20   :  { %v258_v0 = vunpack.c.0.s8 %v257_v58  ;;  %vm960_vm10 = vcmask 654912   ;;  %vm967_vm11 = vcmask 720512   ;;  %vm974_vm12 = vcmask 786112  }
  0x21   :  { %1151 = vmatpush1.bf16.msra.mxu0 %v1150_v22  ;;  %v1329_v62 = vsub.s32 %v194_v55, %v1326_v56  ;;  %vm981_vm13 = vcmask 851712   ;;  %vm988_vm14 = vcmask 917312   ;;  %vm995_vm15 = vcmask 982912  }
  0x22   :  { %1153 = vmatprep.subr.bf16.mxu0 %v1152_v24  ;;  %v1340_v11 = vsub.s32 %v258_v0, %v1326_v56 }
  0x25   :  { %1155 = vmatpush1.bf16.msra.mxu0 %v1154_v29 }
  0x26   :  { %1157 = vmatprep.subr.bf16.mxu0 %v1156_v30 }
  0x29   :  { %1159 = vmatpush1.bf16.msra.mxu0 %v1158_v35 }
  0x2a   :  { %1161 = vmatprep.subr.bf16.mxu0 %v1160_v36 }
  0x2d   :  { %1163 = vmatpush1.bf16.msra.mxu0 %v1162_v39 }
  0x30   :  { %1136 = vmatmul.mubr.msk.f32.vlgmr.msra.gmra.mrb[0].mxu0 %vm67_vm0, %v36_v40  ;;  %vm1002_vm0 = vcmask 1048512  }
  0x9a   :  { %v65_v41 = vpop.permute.xlu0 %64 }
 0x103   :  { %v137_v42 = vpop.f32.mrb[0].mxu0 }
 0x104   :  { %v138_v43 = vadd.f32 %v137_v42, %v65_v41  ;;  %v139_v44 = vpop.f32.mrb[1].mxu0 }
 0x105   :  { %v140_v46 = vadd.f32 %v139_v44, %v65_v41 }
 0x106   :  { %v1287_v45 = vmax.f32 %v138_v43, 0.0 }
 0x107   :  { %v1305_v47 = vmax.f32 %v140_v46, 0.0 }
 0x108   :  { %148 = vrot.lane.b32.xlu1 %v1287_v45, %s1219_s10  ;;  %145 = vrot.lane.b32.xlu0 %v1287_v45, %s1220_s11 }
 0x10c   :  { %151 = vrot.lane.b32.xlu1 %v1287_v45, %s1221_s12  ;;  %154 = vrot.lane.b32.xlu0 %v1287_v45, %s1222_s13 }
 0x110   :  { %157 = vrot.lane.b32.xlu1 %v1287_v45, %s1223_s1  ;;  %160 = vrot.lane.b32.xlu0 %v1287_v45, %s1224_s14 }
 0x114   :  { %163 = vrot.lane.b32.xlu1 %v1287_v45, %s1225_s15  ;;  %166 = vrot.lane.b32.xlu0 %v1287_v45, %s1226_s16 }
 0x118   :  { %169 = vrot.lane.b32.xlu1 %v1287_v45, %s1227_s17  ;;  %172 = vrot.lane.b32.xlu0 %v1287_v45, %s1228_s18 }
 0x11c   :  { %175 = vrot.lane.b32.xlu1 %v1287_v45, %s1229_s19  ;;  %178 = vrot.lane.b32.xlu0 %v1287_v45, %s1230_s20 }
 0x120   :  { %181 = vrot.lane.b32.xlu1 %v1287_v45, %s1231_s21  ;;  %184 = vrot.lane.b32.xlu0 %v1287_v45, %s1216_s30 }
 0x124   :  { %187 = vrot.lane.b32.xlu1 %v1287_v45, %s1232_s22  ;;  %512 = vrot.lane.b32.xlu0 %v1305_v47, %s1220_s11 }
 0x128   :  { %515 = vrot.lane.b32.xlu1 %v1305_v47, %s1219_s10  ;;  %518 = vrot.lane.b32.xlu0 %v1305_v47, %s1221_s12 }
 0x12c   :  { %521 = vrot.lane.b32.xlu1 %v1305_v47, %s1222_s13  ;;  %524 = vrot.lane.b32.xlu0 %v1305_v47, %s1223_s1 }
 0x130   :  { %527 = vrot.lane.b32.xlu1 %v1305_v47, %s1224_s14  ;;  %530 = vrot.lane.b32.xlu0 %v1305_v47, %s1225_s15 }
 0x134   :  { %533 = vrot.lane.b32.xlu1 %v1305_v47, %s1226_s16  ;;  %536 = vrot.lane.b32.xlu0 %v1305_v47, %s1227_s17 }
 0x138   :  { %539 = vrot.lane.b32.xlu1 %v1305_v47, %s1228_s18  ;;  %542 = vrot.lane.b32.xlu0 %v1305_v47, %s1229_s19 }
 0x13c   :  { %545 = vrot.lane.b32.xlu1 %v1305_v47, %s1230_s20  ;;  %548 = vrot.lane.b32.xlu0 %v1305_v47, %s1231_s21 }
 0x140   :  { %551 = vrot.lane.b32.xlu1 %v1305_v47, %s1216_s30  ;;  %554 = vrot.lane.b32.xlu0 %v1305_v47, %s1232_s22 }
 0x17a   :  { %v149_v48 = vpop.permute.xlu1 %148  ;;  %v146_v49 = vpop.permute.xlu0 %145 }
 0x17b   :  { %v190_v63 = vcombine.low %v1287_v45, %v149_v48  ;;  %v191_v10 = vcombine.high %v1287_v45, %v149_v48 }
 0x17d   :  { %v1336_v7 = vrot.slane %v190_v63, %v1329_v62  ;;  %v1362_v21 = vrot.slane %v191_v10, %v1329_v62 }
 0x17e   :  { %v152_v53 = vpop.permute.xlu1 %151  ;;  %v155_v54 = vpop.permute.xlu0 %154 }
 0x17f   :  { %v206_v59 = vcombine.low %v146_v49, %v152_v53  ;;  %v207_v3 = vcombine.high %v146_v49, %v152_v53 }
 0x181   :  { %v1333_v1 = vrot.slane %v206_v59, %v1329_v62  ;;  %v1354_v16 = vrot.slane %v207_v3, %v1329_v62 }
 0x182   :  { %v158_v60 = vpop.permute.xlu1 %157  ;;  %v161_v61 = vpop.permute.xlu0 %160 }
 0x183   :  { %v222_v2 = vcombine.low %v155_v54, %v161_v61  ;;  %v223_v4 = vcombine.high %v155_v54, %v161_v61  ;;  %v254_v12 = vcombine.low %v1336_v7, %v1333_v1  ;;  %v271_v25 = vcombine.high %v1362_v21, %v1354_v16 }
 0x185   :  { %v1345_v13 = vrot.slane %v222_v2, %v1329_v62  ;;  %v1357_v17 = vrot.slane %v223_v4, %v1329_v62  ;;  %v1367_v23 = vrot.slane %v254_v12, %v1340_v11  ;;  %v285_v34 = vrot.slane %v271_v25, %v1340_v11 }
 0x186   :  { %v164_v5 = vpop.permute.xlu1 %163  ;;  %v167_v6 = vpop.permute.xlu0 %166 }
 0x187   :  { %v238_v8 = vcombine.low %v158_v60, %v164_v5  ;;  %v239_v9 = vcombine.high %v158_v60, %v164_v5 }
 0x189   :  { %v1348_v14 = vrot.slane %v238_v8, %v1329_v62  ;;  %v1351_v15 = vrot.slane %v239_v9, %v1329_v62 }
 0x18a   :  { %v170_v18 = vpop.permute.xlu1 %169  ;;  %v173_v19 = vpop.permute.xlu0 %172 }
 0x18b   :  { %v286_v20 = vcombine.low %v1345_v13, %v1348_v14  ;;  %v303_v22 = vcombine.high %v1357_v17, %v1351_v15  ;;  %v326_v35 = vcombine.low %v167_v6, %v173_v19  ;;  %v327_v50 = vcombine.high %v167_v6, %v173_v19 }
 0x18d   :  { %v1370_v24 = vrot.slane %v286_v20, %v1340_v11  ;;  %v317_v29 = vrot.slane %v303_v22, %v1340_v11  ;;  %v1391_v46 = vrot.slane %v326_v35, %v1329_v62  ;;  %v1411_v63 = vrot.slane %v327_v50, %v1329_v62 }
 0x18e   :  { %v176_v26 = vpop.permute.xlu1 %175  ;;  %v179_v27 = vpop.permute.xlu0 %178  ;;  %v287_v20 = vcombine.high %v1345_v13, %v1348_v14 }
 0x18f   :  { %v318_v28 = vcombine.low %v1367_v23, %v1370_v24  ;;  %v342_v30 = vcombine.low %v170_v18, %v176_v26  ;;  %v324_v36 = vcombine.low %v285_v34, %v317_v29  ;;  %v325_v37 = vcombine.high %v285_v34, %v317_v29 }
 0x190   :  { %v343_v40 = vcombine.high %v170_v18, %v176_v26  ;;  %v255_v18 = vcombine.high %v1336_v7, %v1333_v1  ;;  %v319_v25 = vcombine.high %v1367_v23, %v1370_v24  ;;  %v301_v23 = vrot.slane %v287_v20, %v1340_v11 }
 0x191   :  { %v463_v31 = vsel %vm462_vm1, %v318_v28, -inf  ;;  %v1380_v38 = vrot.slane %v342_v30, %v1329_v62  ;;  %v1385_v44 = vsel %vm462_vm1, %v324_v36, -inf  ;;  %v1388_v45 = vsel %vm462_vm1, %v325_v37, -inf }
 0x192   :  { %v182_v32 = vpop.permute.xlu1 %181  ;;  %464 = vmax.xlane.f32.xlu1 %v463_v31  ;;  %v185_v33 = vpop.permute.xlu0 %184  ;;  %v1401_v57 = vrot.slane %v343_v40, %v1329_v62  ;;  %v269_v13 = vrot.slane %v255_v18, %v1340_v11  ;;  %v469_v14 = vsel %vm462_vm1, %v319_v25, -inf  ;;  %v270_v20 = vcombine.low %v1362_v21, %v1354_v16 }
 0x193   :  { %v358_v39 = vcombine.low %v179_v27, %v185_v33  ;;  %v359_v41 = vcombine.high %v179_v27, %v185_v33  ;;  %v390_v51 = vcombine.low %v1391_v46, %v1380_v38  ;;  %v391_v37 = vcombine.high %v1391_v46, %v1380_v38 }
 0x194   :  { %v407_v6 = vcombine.high %v1411_v63, %v1401_v57 }
 0x195   :  { %v366_v53 = vrot.slane %v358_v39, %v1329_v62  ;;  %v1404_v58 = vrot.slane %v359_v41, %v1329_v62  ;;  %v398_v4 = vrot.slane %v390_v51, %v1340_v11  ;;  %v302_v51 = vcombine.low %v1357_v17, %v1351_v15 }
 0x196   :  { %v188_v42 = vpop.permute.xlu1 %187  ;;  %v1382_v43 = vpop.permute.xlu0 %512  ;;  %v421_v31 = vrot.slane %v407_v6, %v1340_v11  ;;  %v405_v6 = vrot.slane %v391_v37, %v1340_v11 }
 0x197   :  { %v374_v48 = vcombine.low %v182_v32, %v188_v42  ;;  %v375_v49 = vcombine.high %v182_v32, %v188_v42 }
 0x199   :  { %v382_v54 = vrot.slane %v374_v48, %v1329_v62  ;;  %v1398_v55 = vrot.slane %v375_v49, %v1329_v62 }
 0x19a   :  { %v1406_v59 = vpop.permute.xlu1 %515  ;;  %v1408_v60 = vpop.permute.xlu0 %518 }
 0x19b   :  { %v422_v61 = vcombine.low %v366_v53, %v382_v54  ;;  %v439_v0 = vcombine.high %v1404_v58, %v1398_v55  ;;  %v558_v2 = vcombine.high %v1305_v47, %v1406_v59  ;;  %v574_v3 = vcombine.high %v1382_v43, %v1408_v60 }
 0x19c   :  { %v423_v33 = vcombine.high %v366_v53, %v382_v54  ;;  %v320_v53 = vcombine.low %v269_v13, %v301_v23  ;;  %v321_v54 = vcombine.high %v269_v13, %v301_v23 }
 0x19d   :  { %v430_v5 = vrot.slane %v422_v61, %v1340_v11  ;;  %v572_v8 = vrot.slane %v558_v2, %v1329_v62  ;;  %v588_v9 = vrot.slane %v574_v3, %v1329_v62  ;;  %v453_v26 = vrot.slane %v439_v0, %v1340_v11 }
 0x19e   :  { %v1425_v10 = vpop.permute.xlu1 %521  ;;  %v1427_v12 = vpop.permute.xlu0 %524  ;;  %v1461_v46 = vrot.slane %v423_v33, %v1340_v11  ;;  %v557_v3 = vcombine.low %v1305_v47, %v1406_v59  ;;  %v481_v47 = vsel %vm462_vm1, %v321_v54, -inf  ;;  %v1475_v59 = vrot.slane %v302_v51, %v1340_v11 }
 0x19f   :  { %v454_v19 = vcombine.low %v398_v4, %v430_v5  ;;  %v637_v22 = vcombine.low %v572_v8, %v588_v9  ;;  %v638_v28 = vcombine.high %v572_v8, %v588_v9  ;;  %v460_v24 = vcombine.low %v421_v31, %v453_v26 }
 0x1a0   :  { %v455_v36 = vcombine.high %v398_v4, %v430_v5  ;;  %v461_v42 = vcombine.high %v421_v31, %v453_v26  ;;  %v456_v26 = vcombine.low %v405_v6, %v1461_v46  ;;  %v1485_v16 = vrot.slane %v557_v3, %v1329_v62 }
 0x1a1   :  { %v466_v27 = vsel %vm462_vm1, %v454_v19, -inf  ;;  %v1444_v32 = vrot.slane %v637_v22, %v1340_v11  ;;  %v1451_v41 = vsel %vm462_vm1, %v460_v24, -inf  ;;  %v652_v48 = vrot.slane %v638_v28, %v1340_v11 }
 0x1a2   :  { %v528_v29 = vpop.permute.xlu1 %527  ;;  %467 = vmax.xlane.f32.xlu0 %v466_v27  ;;  %v531_v30 = vpop.permute.xlu0 %530  ;;  %v1457_v61 = vsel %vm462_vm1, %v461_v42, -inf  ;;  %v472_v38 = vsel %vm462_vm1, %v455_v36, -inf  ;;  %v475_v22 = vsel %vm462_vm1, %v320_v53, -inf  ;;  %v438_v27 = vcombine.low %v1404_v58, %v1398_v55 }
 0x1a3   :  { %v590_v1 = vcombine.high %v1425_v10, %v528_v29  ;;  %v606_v7 = vcombine.high %v1427_v12, %v531_v30  ;;  %v589_v4 = vcombine.low %v1425_v10, %v528_v29  ;;  %v605_v15 = vcombine.low %v1427_v12, %v531_v30 }
 0x1a4   :  { %v573_v10 = vcombine.low %v1382_v43, %v1408_v60  ;;  %v478_v23 = vsel %vm462_vm1, %v456_v26, -inf  ;;  %v457_v54 = vcombine.high %v405_v6, %v1461_v46 }
 0x1a5   :  { %v604_v34 = vrot.slane %v590_v1, %v1329_v62  ;;  %v620_v35 = vrot.slane %v606_v7, %v1329_v62  ;;  %v1488_v21 = vrot.slane %v589_v4, %v1329_v62  ;;  %v1491_v28 = vrot.slane %v605_v15, %v1329_v62 }
 0x1a6   :  { %v534_v39 = vpop.permute.xlu1 %533  ;;  %470 = vmax.xlane.f32.xlu0 %v469_v14  ;;  %v537_v40 = vpop.permute.xlu0 %536  ;;  %v1502_v14 = vrot.slane %v573_v10, %v1329_v62  ;;  %v278_v4 = vrot.slane %v270_v20, %v1340_v11  ;;  %v484_v46 = vsel %vm462_vm1, %v457_v54, -inf }
 0x1a7   :  { %v669_v49 = vcombine.low %v604_v34, %v620_v35  ;;  %v670_v50 = vcombine.high %v604_v34, %v620_v35  ;;  %v653_v51 = vcombine.low %v1488_v21, %v1491_v28 }
 0x1a8   :  { %v322_v6 = vcombine.low %v278_v4, %v1475_v59 }
 0x1a9   :  { %v677_v0 = vrot.slane %v669_v49, %v1340_v11  ;;  %v684_v2 = vrot.slane %v670_v50, %v1340_v11  ;;  %v406_v50 = vcombine.low %v1411_v63, %v1401_v57  ;;  %v446_v57 = vrot.slane %v438_v27, %v1340_v11 }
 0x1aa   :  { %v540_v17 = vpop.permute.xlu1 %539  ;;  %473 = vmax.xlane.f32.xlu0 %v472_v38  ;;  %v543_v5 = vpop.permute.xlu0 %542  ;;  %v621_v63 = vcombine.low %v1485_v16, %v1502_v14 }
 0x1ab   :  { %v693_v8 = vcombine.low %v534_v39, %v540_v17  ;;  %v694_v9 = vcombine.high %v534_v39, %v540_v17  ;;  %v709_v18 = vcombine.low %v537_v40, %v543_v5  ;;  %v710_v19 = vcombine.high %v537_v40, %v543_v5 }
 0x1ac   :  { %v689_v58 = vcombine.low %v1444_v32, %v677_v0  ;;  %v690_v1 = vcombine.high %v1444_v32, %v677_v0  ;;  %v691_v7 = vcombine.low %v652_v48, %v684_v2  ;;  %v692_v13 = vcombine.high %v652_v48, %v684_v2 }
 0x1ad   :  { %v708_v12 = vrot.slane %v694_v9, %v1329_v62  ;;  %v724_v25 = vrot.slane %v710_v19, %v1329_v62  ;;  %v1494_v60 = vrot.slane %v693_v8, %v1329_v62  ;;  %v1497_v30 = vrot.slane %v709_v18, %v1329_v62 }
 0x1ae   :  { %v546_v29 = vpop.permute.xlu1 %545  ;;  %476 = vmax.xlane.f32.xlu0 %v475_v22  ;;  %v549_v43 = vpop.permute.xlu0 %548  ;;  %v1508_v36 = vsel %vm462_vm1, %v689_v58, -inf  ;;  %v1511_v37 = vsel %vm462_vm1, %v690_v1, -inf  ;;  %v1514_v32 = vsel %vm462_vm1, %v691_v7, -inf  ;;  %v1517_v39 = vsel %vm462_vm1, %v692_v13, -inf }
 0x1af   :  { %v773_v31 = vcombine.low %v708_v12, %v724_v25  ;;  %v774_v55 = vcombine.high %v708_v12, %v724_v25  ;;  %v757_v53 = vcombine.low %v1494_v60, %v1497_v30  ;;  %v414_v8 = vrot.slane %v406_v50, %v1340_v11 }
 0x1b0   :  { %v661_v9 = vrot.slane %v653_v51, %v1340_v11  ;;  %v629_v10 = vrot.slane %v621_v63, %v1340_v11 }
 0x1b1   :  { %v781_v24 = vrot.slane %v773_v31, %v1340_v11  ;;  %v788_v33 = vrot.slane %v774_v55, %v1340_v11 }
 0x1b2   :  { %v552_v34 = vpop.permute.xlu1 %551  ;;  %479 = vmax.xlane.f32.xlu0 %v478_v23  ;;  %v555_v35 = vpop.permute.xlu0 %554  ;;  %v686_v55 = vcombine.high %v629_v10, %v661_v9  ;;  %v622_v23 = vcombine.high %v1485_v16, %v1502_v14  ;;  %v459_v14 = vcombine.high %v414_v8, %v446_v57  ;;  %v685_v54 = vcombine.low %v629_v10, %v661_v9 }
 0x1b3   :  { %v725_v40 = vcombine.low %v546_v29, %v552_v34  ;;  %v726_v42 = vcombine.high %v546_v29, %v552_v34  ;;  %v741_v48 = vcombine.low %v549_v43, %v555_v35  ;;  %v742_v49 = vcombine.high %v549_v43, %v555_v35 }
 0x1b4   :  { %v654_v29 = vcombine.high %v1488_v21, %v1491_v28  ;;  %v487_v43 = vsel %vm462_vm1, %v322_v6, -inf  ;;  %v323_v28 = vcombine.high %v278_v4, %v1475_v59  ;;  %v496_v51 = vsel %vm462_vm1, %v459_v14, -inf }
 0x1b5   :  { %v733_v38 = vrot.slane %v725_v40, %v1329_v62  ;;  %v740_v0 = vrot.slane %v726_v42, %v1329_v62  ;;  %v749_v2 = vrot.slane %v741_v48, %v1329_v62  ;;  %v756_v3 = vrot.slane %v742_v49, %v1329_v62 }
 0x1b6   :  { %482 = vmax.xlane.f32.xlu0 %v481_v47  ;;  %v765_v62 = vrot.slane %v757_v53, %v1340_v11  ;;  %v458_v47 = vcombine.low %v414_v8, %v446_v57  ;;  %v668_v35 = vrot.slane %v654_v29, %v1340_v11  ;;  %v758_v40 = vcombine.high %v1494_v60, %v1497_v30 }
 0x1b7   :  { %v789_v15 = vcombine.low %v733_v38, %v749_v2  ;;  %v805_v17 = vcombine.low %v740_v0, %v756_v3  ;;  %v806_v5 = vcombine.high %v740_v0, %v756_v3  ;;  %v636_v42 = vrot.slane %v622_v23, %v1340_v11 }
 0x1b8   :  { %v490_v21 = vsel %vm462_vm1, %v458_v47, -inf  ;;  %v493_v48 = vsel %vm462_vm1, %v323_v28, -inf  ;;  %v772_v50 = vrot.slane %v758_v40, %v1340_v11  ;;  %v829_v30 = vsel %vm462_vm1, %v685_v54, -inf }
 0x1b9   :  { %v797_v18 = vrot.slane %v789_v15, %v1340_v11  ;;  %v813_v19 = vrot.slane %v805_v17, %v1340_v11  ;;  %v820_v20 = vrot.slane %v806_v5, %v1340_v11  ;;  %v687_v49 = vcombine.low %v636_v42, %v668_v35 }
 0x1ba   :  { %485 = vmax.xlane.f32.xlu0 %v484_v46  ;;  %v688_v0 = vcombine.high %v636_v42, %v668_v35 }
 0x1bb   :  { %v821_v22 = vcombine.low %v765_v62, %v797_v18  ;;  %v825_v12 = vcombine.low %v781_v24, %v813_v19  ;;  %v826_v25 = vcombine.high %v781_v24, %v813_v19  ;;  %v827_v26 = vcombine.low %v788_v33, %v820_v20 }
 0x1bc   :  { %v828_v27 = vcombine.high %v788_v33, %v820_v20  ;;  %v790_v24 = vcombine.high %v733_v38, %v749_v2  ;;  %v835_v33 = vsel %vm462_vm1, %v686_v55, -inf  ;;  %v822_v34 = vcombine.high %v765_v62, %v797_v18 }
 0x1bd   :  { %v832_v31 = vsel %vm462_vm1, %v821_v22, -inf  ;;  %v856_v58 = vsel %vm462_vm1, %v825_v12, -inf  ;;  %v862_v1 = vsel %vm462_vm1, %v826_v25, -inf  ;;  %v868_v7 = vsel %vm462_vm1, %v827_v26, -inf }
 0x1be   :  { %488 = vmax.xlane.f32.xlu0 %v487_v43  ;;  %833 = vmax.xlane.f32.xlu1 %v832_v31  ;;  %v874_v13 = vsel %vm462_vm1, %v828_v27, -inf  ;;  %v838_v16 = vsel %vm462_vm1, %v822_v34, -inf  ;;  %v804_v59 = vrot.slane %v790_v24, %v1340_v11  ;;  %v841_v53 = vsel %vm462_vm1, %v687_v49, -inf }
 0x1bf   :  { %v847_v2 = vsel %vm462_vm1, %v688_v0, -inf  ;;  %v1611_v18 = vand.u32 127, %v195_v52 }
 0x1c0   :  { %v823_v60 = vcombine.low %v772_v50, %v804_v59  ;;  %v824_v3 = vcombine.high %v772_v50, %v804_v59 }
 0x1c1   :  { %v899_v19 = vadd.s32 4294967288, %v1611_v18  ;;  %v897_v47 = vsub.s32 %v1611_v18, %v1326_v56  ;;  %v906_v10 = vadd.s32 4294967280, %v1611_v18  ;;  %v913_v27 = vadd.s32 4294967272, %v1611_v18 }
 0x1c2   :  { %491 = vmax.xlane.f32.xlu0 %v490_v21  ;;  %836 = vmax.xlane.f32.xlu1 %v835_v33  ;;  %v844_v38 = vsel %vm462_vm1, %v823_v60, -inf  ;;  %v850_v11 = vsel %vm462_vm1, %v824_v3, -inf  ;;  %v920_v52 = vadd.s32 4294967264, %v1611_v18  ;;  %v927_v31 = vadd.s32 4294967256, %v1611_v18 }
 0x1c3   :  { %v902_v12 = vsub.s32 %v899_v19, %v1326_v56  ;;  %v909_v43 = vsub.s32 %v906_v10, %v1326_v56  ;;  %v916_v21 = vsub.s32 %v913_v27, %v1326_v56  ;;  %v948_v24 = vadd.s32 4294967232, %v1611_v18 }
 0x1c4   :  { %v923_v28 = vsub.s32 %v920_v52, %v1326_v56  ;;  %v930_v33 = vsub.s32 %v927_v31, %v1326_v56  ;;  %v955_v34 = vadd.s32 4294967224, %v1611_v18  ;;  %v962_v42 = vadd.s32 4294967216, %v1611_v18 }
 0x1c5   :  { %v976_v49 = vadd.s32 4294967200, %v1611_v18  ;;  %v983_v0 = vadd.s32 4294967192, %v1611_v18  ;;  %vm1101_vm1 = vcmask 1040384  }
 0x1c6   :  { %494 = vmax.xlane.f32.xlu0 %v493_v48  ;;  %839 = vmax.xlane.f32.xlu1 %v838_v16  ;;  %v969_v48 = vadd.s32 4294967208, %v1611_v18 }
 0x1ca   :  { %497 = vmax.xlane.f32.xlu0 %v496_v51  ;;  %842 = vmax.xlane.f32.xlu1 %v841_v53  ;;  %v951_v53 = vsub.s32 %v948_v24, %v1326_v56 }
 0x1ce   :  { %830 = vmax.xlane.f32.xlu0 %v829_v30  ;;  %845 = vmax.xlane.f32.xlu1 %v844_v38  ;;  %v958_v30 = vsub.s32 %v955_v34, %v1326_v56 }
 0x1d2   :  { %500 = vmax.xlane.f32.xlu0 %v1385_v44  ;;  %848 = vmax.xlane.f32.xlu1 %v847_v2 }
 0x1d6   :  { %503 = vmax.xlane.f32.xlu0 %v1451_v41  ;;  %851 = vmax.xlane.f32.xlu1 %v850_v11  ;;  %v965_v11 = vsub.s32 %v962_v42, %v1326_v56 }
 0x1da   :  { %506 = vmax.xlane.f32.xlu0 %v1388_v45  ;;  %854 = vmax.xlane.f32.xlu1 %v1508_v36 }
 0x1de   :  { %509 = vmax.xlane.f32.xlu0 %v1457_v61  ;;  %857 = vmax.xlane.f32.xlu1 %v856_v58 }
 0x1e2   :  { %860 = vmax.xlane.f32.xlu1 %v1511_v37 }
 0x1e6   :  { %863 = vmax.xlane.f32.xlu1 %v862_v1  ;;  %v934_v1 = vadd.s32 4294967248, %v1611_v18 }
 0x1e8   :  { %v937_v16 = vsub.s32 %v934_v1, %v1326_v56 }
 0x1ea   :  { %866 = vmax.xlane.f32.xlu1 %v1514_v32 }
 0x1ee   :  { %869 = vmax.xlane.f32.xlu1 %v868_v7  ;;  %v941_v7 = vadd.s32 4294967240, %v1611_v18 }
 0x1f0   :  { %v944_v14 = vsub.s32 %v941_v7, %v1326_v56 }
 0x1f2   :  { %872 = vmax.xlane.f32.xlu1 %v1517_v39 }
 0x1f6   :  { %875 = vmax.xlane.f32.xlu1 %v874_v13 }
 0x21f   :  { %v1590_v37 = vpop.xlane.xlu1 %464 }
 0x220   :  { %v898_v2 = vrot.slane %v1590_v37, %v897_v47 }
 0x22f   :  { %v1578_v44 = vpop.xlane.xlu0 %467 }
 0x230   :  { %v903_v51 = vrot.slane %v1578_v44, %v902_v12  ;;  %v972_v44 = vsub.s32 %v969_v48, %v1326_v56 }
 0x232   :  { %v905_v19 = vsel %vm904_vm2, %v903_v51, %v898_v2  ;;  %v1137_v2 = vld [vmem:[%s1714_s3] ss:$0 sm:$0xff] }
 0x233   :  { %v1580_v41 = vpop.xlane.xlu0 %470 }
 0x234   :  { %v910_v60 = vrot.slane %v1580_v41, %v909_v43 }
 0x237   :  { %v1582_v4 = vpop.xlane.xlu0 %473 }
 0x238   :  { %v917_v3 = vrot.slane %v1582_v4, %v916_v21 }
 0x23b   :  { %v1584_v45 = vpop.xlane.xlu0 %476 }
 0x23f   :  { %v1586_v36 = vpop.xlane.xlu0 %479 }
 0x240   :  { %v931_v37 = vrot.slane %v1586_v36, %v930_v33 }
 0x243   :  { %v1588_v61 = vpop.xlane.xlu0 %482 }
 0x247   :  { %v1592_v57 = vpop.xlane.xlu0 %485 }
 0x248   :  { %v945_v52 = vrot.slane %v1592_v57, %v944_v14 }
 0x24b   :  { %v834_v32 = vpop.xlane.xlu1 %833  ;;  %v1594_v63 = vpop.xlane.xlu0 %488 }
 0x24c   :  { %v1028_v29 = vrot.slane %v834_v32, %v902_v12  ;;  %v924_v32 = vrot.slane %v1584_v45, %v923_v28  ;;  %v938_v45 = vrot.slane %v1588_v61, %v937_v16  ;;  %v986_v12 = vsub.s32 %v983_v0, %v1326_v56 }
 0x24f   :  { %v837_v39 = vpop.xlane.xlu1 %836  ;;  %v1596_v17 = vpop.xlane.xlu0 %491 }
 0x250   :  { %v1033_v13 = vrot.slane %v837_v39, %v909_v43  ;;  %v979_v39 = vsub.s32 %v976_v49, %v1326_v56 }
 0x253   :  { %v840_v15 = vpop.xlane.xlu1 %839  ;;  %v1600_v46 = vpop.xlane.xlu0 %494 }
 0x254   :  { %v1038_v40 = vrot.slane %v840_v15, %v916_v21  ;;  %v990_v15 = vadd.s32 4294967184, %v1611_v18 }
 0x257   :  { %v1598_v5 = vpop.xlane.xlu1 %842  ;;  %v1606_v9 = vpop.xlane.xlu0 %497 }
 0x258   :  { %v1043_v38 = vrot.slane %v1598_v5, %v923_v28  ;;  %v973_v21 = vrot.slane %v1606_v9, %v972_v44 }
 0x25b   :  { %v1602_v6 = vpop.xlane.xlu1 %845  ;;  %v831_v20 = vpop.xlane.xlu0 %830 }
 0x25c   :  { %v1024_v25 = vrot.slane %v831_v20, %v897_v47  ;;  %v1048_v4 = vrot.slane %v1602_v6, %v930_v33  ;;  %v997_v20 = vadd.s32 4294967176, %v1611_v18  ;;  %v912_v47 = vsel %vm911_vm3, %v910_v60, %v905_v19 }
 0x25d   :  { %v919_v27 = vsel %vm918_vm4, %v917_v3, %v912_v47 }
 0x25e   :  { %v1029_v58 = vsel %vm904_vm2, %v1028_v29, %v1024_v25  ;;  %v926_v18 = vsel %vm925_vm5, %v924_v32, %v919_v27  ;;  %v952_v29 = vrot.slane %v1594_v63, %v951_v53  ;;  %v1000_v57 = vsub.s32 %v997_v20, %v1326_v56 }
 0x25f   :  { %v1604_v8 = vpop.xlane.xlu1 %848  ;;  %v1626_v55 = vpop.xlane.xlu0 %500  ;;  %v1034_v35 = vsel %vm911_vm3, %v1033_v13, %v1029_v58  ;;  %v933_v31 = vsel %vm932_vm6, %v931_v37, %v926_v18  ;;  %v959_v58 = vrot.slane %v1596_v17, %v958_v30  ;;  %vm1111_vm2 = vcmask 1041408  }
 0x260   :  { %v1039_v54 = vsel %vm918_vm4, %v1038_v40, %v1034_v35  ;;  %v1053_v10 = vrot.slane %v1604_v8, %v937_v16  ;;  %v993_v8 = vsub.s32 %v990_v15, %v1326_v56  ;;  %v940_v7 = vsel %vm939_vm7, %v938_v45, %v933_v31 }
 0x261   :  { %v1044_v41 = vsel %vm925_vm5, %v1043_v38, %v1039_v54  ;;  %v980_v56 = vrot.slane %v1626_v55, %v979_v39  ;;  %vm1129_vm3 = vcmask 1024  }
 0x262   :  { %v1049_v36 = vsel %vm932_vm6, %v1048_v4, %v1044_v41 }
 0x263   :  { %v1608_v62 = vpop.xlane.xlu1 %851  ;;  %v1644_v59 = vpop.xlane.xlu0 %503  ;;  %v1054_v13 = vsel %vm939_vm7, %v1053_v10, %v1049_v36 }
 0x264   :  { %v1058_v6 = vrot.slane %v1608_v62, %v944_v14  ;;  %v966_v62 = vrot.slane %v1600_v46, %v965_v11 }
 0x266   :  { %v1059_v28 = vsel %vm946_vm8, %v1058_v6, %v1054_v13 }
 0x267   :  { %v1614_v22 = vpop.xlane.xlu1 %854  ;;  %v507_v25 = vpop.xlane.xlu0 %506 }
 0x268   :  { %v1063_v61 = vrot.slane %v1614_v22, %v951_v53  ;;  %v947_v22 = vsel %vm946_vm8, %v945_v52, %v940_v7  ;;  %v994_v48 = vrot.slane %v507_v25, %v993_v8 }
 0x26a   :  { %v1064_v24 = vsel %vm953_vm9, %v1063_v61, %v1059_v28 }
 0x26b   :  { %v1620_v26 = vpop.xlane.xlu1 %857  ;;  %v510_v33 = vpop.xlane.xlu0 %509 }
 0x26c   :  { %v1068_v1 = vrot.slane %v1620_v26, %v958_v30  ;;  %v954_v26 = vsel %vm953_vm9, %v952_v29, %v947_v22  ;;  %v1001_v49 = vrot.slane %v510_v33, %v1000_v57 }
 0x26d   :  { %v961_v35 = vsel %vm960_vm10, %v959_v58, %v954_v26 }
 0x26e   :  { %v1069_v40 = vsel %vm960_vm10, %v1068_v1, %v1064_v24  ;;  %v968_v42 = vsel %vm967_vm11, %v966_v62, %v961_v35 }
 0x26f   :  { %v1631_v23 = vpop.xlane.xlu1 %860  ;;  %v975_v55 = vsel %vm974_vm12, %v973_v21, %v968_v42 }
 0x270   :  { %v1073_v63 = vrot.slane %v1631_v23, %v965_v11  ;;  %v987_v23 = vrot.slane %v1644_v59, %v986_v12  ;;  %v982_v51 = vsel %vm981_vm13, %v980_v56, %v975_v55 }
 0x272   :  { %v1074_v16 = vsel %vm967_vm11, %v1073_v63, %v1069_v40  ;;  %v989_v54 = vsel %vm988_vm14, %v987_v23, %v982_v51 }
 0x273   :  { %v1646_v50 = vpop.xlane.xlu1 %863  ;;  %v996_v38 = vsel %vm995_vm15, %v994_v48, %v989_v54 }
 0x274   :  { %v1078_v17 = vrot.slane %v1646_v50, %v972_v44  ;;  %v1003_v3 = vsel %vm1002_vm0, %v1001_v49, %v996_v38 }
 0x276   :  { %v1079_v50 = vsel %vm974_vm12, %v1078_v17, %v1074_v16 }
 0x277   :  { %v867_v5 = vpop.xlane.xlu1 %866 }
 0x278   :  { %v1083_v46 = vrot.slane %v867_v5, %v979_v39  ;;  %v1138_v39 = vld [vmem:[#allocation2] ss:$0 sm:$0xff] }
 0x27a   :  { %v1084_v59 = vsel %vm981_vm13, %v1083_v46, %v1079_v50 }
 0x27b   :  { %v870_v43 = vpop.xlane.xlu1 %869 }
 0x27c   :  { %v1088_v9 = vrot.slane %v870_v43, %v986_v12 }
 0x27e   :  { %v1089_v60 = vsel %vm988_vm14, %v1088_v9, %v1084_v59 }
 0x27f   :  { %v873_v34 = vpop.xlane.xlu1 %872 }
 0x280   :  { %v1093_v14 = vrot.slane %v873_v34, %v993_v8 }
 0x282   :  { %v1094_v0 = vsel %vm995_vm15, %v1093_v14, %v1089_v60 }
 0x283   :  { %v876_v53 = vpop.xlane.xlu1 %875 }
 0x284   :  { %v1098_v30 = vrot.slane %v876_v53, %v1000_v57 }
 0x286   :  { %v1099_v11 = vsel %vm1002_vm0, %v1098_v30, %v1094_v0 }
 0x287   :  { %v1102_v44 = vsel %vm1101_vm1, %v1003_v3, %v1099_v11 }
 0x288   :  { %v1110_v32 = vmul.f32 %v1137_v2, %v1102_v44 }
 0x28a   :  { %v1112_v41 = vsel %vm1111_vm2, %v1110_v32, 0.0 }
 0x28b   :  { %1113 = vadd.xlane.f32.xlu0 %v1112_v41 }
 0x318   :  { %v1114_v15 = vpop.xlane.xlu0 %1113 }
 0x319   :  { %v1122_v5 = vadd.f32 %v1138_v39, %v1114_v15 }
 0x31b   :  { %v1139_v19 = vmul.f32 -1.442695, %v1122_v5 }
 0x31d   :  { %1186 = vpow2.f32 %v1139_v19 }
 0x327   :  { %v1187_v37 = vpop.eup %1186 }
 0x328   :  { %v1126_v4 = vadd.f32 1.0, %v1187_v37 }
 0x32a   :  { %1188 = vrcp.f32 %v1126_v4 }
 0x334   :  { %v1189_v20 = vpop.eup %1188 }
 0x335   :  { %1130 = vst.msk [vmem:[%s1716_s5] sm:$0x3] %vm1129_vm3, %v1189_v20 }
 0x336   :  { %1135 = vsyncpa [#allocation4], 1 }

</bundles_post_ra>
